<compile_context>
chip_gen: v7x
topology: tpu7x:2x2x1
jax: 0.10.0
libtpu: 0.0.40
codegen_flags: <defaults>
</compile_context>

<pallas_src>
import jax
import jax.numpy as jnp
from jax import lax
from jax.experimental import pallas as pl
from jax.experimental.pallas import tpu as pltpu


def _round_up(x, m):
    return (x + m - 1) // m * m


def _make_kernel(use_mask, precision):
    """Build the attention kernel body.

    Block shapes seen by the kernel:
      t_ref : (TB, E)          target items (streamed dtype)
      wt_ref: (E, H)           pre-transposed Linear weight W.T (streamed dtype)
      h_ref : (TB, H, L)       history, L on the lane axis (streamed dtype)
      m_ref : (TB, L) int8     optional mask (0 = masked); only if use_mask
      o_ref : (TB, L) f32      softmax attention weights
    """

    def kernel(*refs):
        if use_mask:
            t_ref, wt_ref, h_ref, m_ref, o_ref = refs
        else:
            t_ref, wt_ref, h_ref, o_ref = refs
            m_ref = None

        # query = target @ W.T  -> (TB, H); MXU matmul with f32 accumulation.
        q = jnp.dot(t_ref[...], wt_ref[...],
                    preferred_element_type=jnp.float32,
                    precision=precision)

        # scores: lane axis is L, reduce over the H sublane axis (VALU adds + one
        # cross-sublane XLU reduce per 128-lane group).  Products are formed in f32
        # (exact for bf16-streamed history); the f32 temporaries are accounted for in
        # the VMEM budget used to size the batch tile in the wrapper.
        s = jnp.sum(q[:, :, None] * h_ref[...].astype(jnp.float32), axis=1)  # (TB, L)

        # masked_fill(mask == 0, -inf): masked positions drop out of the softmax
        # denominator; fully-masked rows give NaN, matching PyTorch.
        if use_mask:
            keep = m_ref[...].astype(jnp.int32) != 0
            s = jnp.where(keep, s, -jnp.inf)

        # numerically stable softmax over the history-length axis
        s_max = jnp.max(s, axis=-1, keepdims=True)
        e = jnp.exp(s - s_max)
        denom = jnp.sum(e, axis=-1, keepdims=True)
        o_ref[...] = (e * pl.reciprocal(denom, approx=True)).astype(o_ref.dtype)

    return kernel


def dot_product_attention(target_item, history_hidden, weight, mask=None,
                          stream_dtype=jnp.bfloat16):
    """Pallas TPU DotProductAttention.forward.

    target_item:    (B, E); history_hidden: (B, L, H);
    weight:         (H, E)  = nn.Linear(ad_emb, hidden, bias=False).weight;
    mask:           (B, L)  with 0 = masked position, or None.
    stream_dtype:   dtype used to stream target/weight/history through HBM
                    (default bf16; softmax math is always f32).  None keeps input dtype.
    Returns (B, L) float32 attention weights.
    """
    B, E = target_item.shape
    Bh, L, H = history_hidden.shape
    Hw, Ew = weight.shape
    assert Bh == B and Ew == E and Hw == H, \
        "history hidden dim must equal the Linear output dim"

    if stream_dtype is not None:
        target_item = target_item.astype(stream_dtype)
        history_hidden = history_hidden.astype(stream_dtype)
        weight = weight.astype(stream_dtype)
    s_item = jnp.dtype(target_item.dtype).itemsize
    use_mask = mask is not None

    # ---- generation-aware batch-tile sizing ---------------------------------------
    try:
        vmem_cap = int(pltpu.get_tpu_info().vmem_capacity_bytes)
    except Exception:
        vmem_cap = 64 * 1024 * 1024            # conservative fallback (v7x per-TC)
    if vmem_cap <= 0:
        vmem_cap = 64 * 1024 * 1024

    L_vmem = _round_up(L, 128)                 # lane padding inside VMEM
    H_vmem = _round_up(H, 32)                  # worst-case sublane padding inside VMEM
    per_row = (
        2 * H_vmem * L_vmem * s_item           # streamed history block, double-buffered
        + 2 * H_vmem * L_vmem * 4              # in-kernel f32 upcast + product temporaries
        + 2 * L_vmem * 4                       # f32 output block, double-buffered
        + (2 * L_vmem if use_mask else 0)      # int8 mask block, double-buffered
        + 2 * _round_up(E, 128) * s_item       # target block, double-buffered
        + 8 * L_vmem * 4                       # misc f32 row temporaries (scores, exp, ...)
    )
    fixed = 2 * _round_up(E, 32) * _round_up(H, 128) * s_item + (1 << 20)   # W.T + slack
    budget = max(4 << 20, int(0.30 * vmem_cap) - fixed)

    SUB = 32            # row-tile granularity safe for f32 / bf16 / int8 sublane tilings
    if B >= 2 * SUB:
        tb_cap = int(min(max(budget // per_row, SUB), 512))
        tb = min(tb_cap, _round_up((B + 1) // 2, SUB))   # >= 2 tiles -> both v7x TCs busy
        tb = max(SUB, (tb // SUB) * SUB)
        B_pad = _round_up(B, tb)
    else:
        tb = max(B, 8)                                   # whole small batch in one tile
        B_pad = tb
    num_tiles = B_pad // tb

    # ---- single-pass layout change: (B, L, H) -> (B_pad, H, L) ---------------------
    h_t = jnp.swapaxes(history_hidden, 1, 2)             # (B, H, L)
    if B_pad != B:
        h_t = jnp.zeros((B_pad, H, L), h_t.dtype).at[:B].set(h_t)

    t_p = target_item
    if B_pad != B:
        t_p = jnp.zeros((B_pad, E), t_p.dtype).at[:B].set(t_p)

    wt = weight.T                                         # (E, H): no in-kernel transpose

    operands = [t_p, wt, h_t]
    in_specs = [
        pl.BlockSpec((tb, E), lambda b: (b, 0)),          # target tile
        pl.BlockSpec((E, H), lambda b: (0, 0)),           # W.T (shared across tiles)
        pl.BlockSpec((tb, H, L), lambda b: (b, 0, 0)),    # history tile (lane axis = L)
    ]
    if use_mask:
        m_p = mask.astype(jnp.int8)                       # 4x less mask HBM traffic
        if B_pad != B:
            m_p = jnp.zeros((B_pad, L), jnp.int8).at[:B].set(m_p)
        operands.append(m_p)
        in_specs.append(pl.BlockSpec((tb, L), lambda b: (b, 0)))

    # HIGHEST only when streaming f32 (keeps the f32 path exact); bf16 inputs are
    # already exact on the MXU with default precision.
    precision = lax.Precision.HIGHEST if s_item >= 4 else None
    kernel = _make_kernel(use_mask, precision)

    vmem_limit = int(max(32 << 20, min(int(0.60 * vmem_cap), 112 << 20)))

    out = pl.pallas_call(
        kernel,
        out_shape=jax.ShapeDtypeStruct((B_pad, L), jnp.float32),
        grid_spec=pltpu.PrefetchScalarGridSpec(
            num_scalar_prefetch=0,
            grid=(num_tiles,),
            in_specs=in_specs,
            out_specs=pl.BlockSpec((tb, L), lambda b: (b, 0)),
        ),
        compiler_params=pltpu.CompilerParams(
            dimension_semantics=("parallel",),
            vmem_limit_bytes=vmem_limit,
        ),
    )(*operands)
    return out[:B, :L]


def _reference(target_item, history_hidden, weight, mask):
    q = jnp.dot(target_item, weight.T, precision=lax.Precision.HIGHEST)       # (B, H)
    s = jnp.einsum("bh,blh->bl", q, history_hidden,
                   precision=lax.Precision.HIGHEST)                           # (B, L)
    if mask is not None:
        s = jnp.where(mask == 0, -jnp.inf, s)
    return jax.nn.softmax(s, axis=-1)


if __name__ == "__main__":
    B, L = 2, 8
    hidden_dim = 32
    ad_emb_dim = 32

    key = jax.random.PRNGKey(0)
    k1, k2, k3 = jax.random.split(key, 3)

    # nn.Linear(ad_emb_dim, hidden_dim, bias=False) weight: (hidden, ad_emb)
    W = jax.random.normal(k1, (hidden_dim, ad_emb_dim), dtype=jnp.float32) * 0.1
    target_item = jax.random.normal(k2, (B, ad_emb_dim), dtype=jnp.float32)
    history_hidden = jax.random.normal(k3, (B, L, hidden_dim), dtype=jnp.float32)
    # Mask: last 3 positions of batch 1 are masked out (0 = masked)
    mask = jnp.ones((B, L), dtype=jnp.int32)
    mask = mask.at[1, L - 3:].set(0)

    tq = lambda x: x.astype(jnp.bfloat16).astype(jnp.float32)   # bf16-quantize helper

    # default bf16-streamed path (halves history HBM traffic; softmax math stays f32)
    att_bf16 = jax.block_until_ready(
        dot_product_attention(target_item, history_hidden, W, mask))
    ref_bf16 = _reference(tq(target_item), tq(history_hidden), tq(W), mask)
    assert att_bf16.shape == (B, L)
    assert jnp.allclose(att_bf16, ref_bf16, atol=2e-3, rtol=2e-3), "bf16 mismatch vs reference"

    # full f32 streaming path
    att_f32 = jax.block_until_ready(
        dot_product_attention(target_item, history_hidden, W, mask, stream_dtype=None))
    ref_f32 = _reference(target_item, history_hidden, W, mask)
    assert jnp.allclose(att_f32, ref_f32, atol=2e-3, rtol=2e-3), "f32 mismatch vs reference"

    # mask=None path (no mask operand is streamed at all)
    att_nm = jax.block_until_ready(
        dot_product_attention(target_item, history_hidden, W, None))
    ref_nm = _reference(tq(target_item), tq(history_hidden), tq(W), None)
    assert jnp.allclose(att_nm, ref_nm, atol=2e-3, rtol=2e-3), "no-mask mismatch vs reference"

    print("KERNEL_OK")
</pallas_src>

<mosaic_0001>
module attributes {stable_mosaic.version = 11 : i64} {
  func.func @kernel(%arg0: i32, %arg1: memref<8x32xbf16, #tpu.memory_space<vmem>>, %arg2: memref<32x32xbf16, #tpu.memory_space<vmem>>, %arg3: memref<8x32x8xbf16, #tpu.memory_space<vmem>>, %arg4: memref<8x8xi8, #tpu.memory_space<vmem>>, %arg5: memref<8x8xf32, #tpu.memory_space<vmem>>) attributes {dimension_semantics = [#tpu.dimension_semantics<parallel>], iteration_bounds = array<i64: 1>, scalar_prefetch = 0 : i64, scratch_operands = 0 : i64, tpu.core_type = #tpu.core_type<tc>, window_params = [{transform_indices = @transform_0, window_bounds = array<i64: 8, 32>}, {pipeline_mode = #tpu.pipeline_mode<synchronous>, transform_indices = @transform_1, window_bounds = array<i64: 32, 32>}, {transform_indices = @transform_2, window_bounds = array<i64: 8, 32, 8>}, {transform_indices = @transform_3, window_bounds = array<i64: 8, 8>}, {transform_indices = @transform_4, window_bounds = array<i64: 8, 8>}]} {
    %c0 = arith.constant 0 : index
    %c0_0 = arith.constant 0 : index
    %0 = vector.load %arg1[%c0, %c0_0] : memref<8x32xbf16, #tpu.memory_space<vmem>>, vector<8x32xbf16>
    %c0_1 = arith.constant 0 : index
    %c0_2 = arith.constant 0 : index
    %1 = vector.load %arg2[%c0_1, %c0_2] : memref<32x32xbf16, #tpu.memory_space<vmem>>, vector<32x32xbf16>
    %cst = arith.constant dense<0.000000e+00> : vector<8x32xf32>
    %2 = tpu.matmul %0, %1, %cst {dimension_numbers = #tpu.dot_dimension_numbers<[1], [0], [0], [1], [0, 0, 1, 1], [], []>} : vector<8x32xbf16>, vector<32x32xbf16>, vector<8x32xf32> -> vector<8x32xf32>
    %3 = vector.shape_cast %2 : vector<8x32xf32> to vector<8x32x1xf32>
    %c0_3 = arith.constant 0 : index
    %c0_4 = arith.constant 0 : index
    %c0_5 = arith.constant 0 : index
    %4 = vector.load %arg3[%c0_3, %c0_4, %c0_5] : memref<8x32x8xbf16, #tpu.memory_space<vmem>>, vector<8x32x8xbf16>
    %5 = arith.extf %4 : vector<8x32x8xbf16> to vector<8x32x8xf32>
    %6 = vector.broadcast %3 : vector<8x32x1xf32> to vector<8x32x8xf32>
    %7 = arith.mulf %6, %5 : vector<8x32x8xf32>
    %cst_6 = arith.constant dense<0.000000e+00> : vector<8x8xf32>
    %8 = vector.multi_reduction <add>, %7, %cst_6 [1] : vector<8x32x8xf32> to vector<8x8xf32>
    %c0_7 = arith.constant 0 : index
    %c0_8 = arith.constant 0 : index
    %9 = vector.load %arg4[%c0_7, %c0_8] : memref<8x8xi8, #tpu.memory_space<vmem>>, vector<8x8xi8>
    %10 = arith.extsi %9 : vector<8x8xi8> to vector<8x8xi32>
    %c0_i32 = arith.constant 0 : i32
    %11 = vector.broadcast %c0_i32 : i32 to vector<8x8xi32>
    %12 = arith.cmpi ne, %10, %11 : vector<8x8xi32>
    %cst_9 = arith.constant 0xFF800000 : f32
    %13 = vector.broadcast %cst_9 : f32 to vector<8x8xf32>
    %14 = arith.select %12, %8, %13 : vector<8x8xi1>, vector<8x8xf32>
    %cst_10 = arith.constant dense<0xFF800000> : vector<8xf32>
    %15 = vector.multi_reduction <maximumf>, %14, %cst_10 [1] : vector<8x8xf32> to vector<8xf32>
    %16 = vector.shape_cast %15 : vector<8xf32> to vector<8x1xf32>
    %17 = vector.broadcast %16 : vector<8x1xf32> to vector<8x8xf32>
    %18 = arith.subf %14, %17 : vector<8x8xf32>
    %19 = math.exp %18 : vector<8x8xf32>
    %cst_11 = arith.constant dense<0.000000e+00> : vector<8xf32>
    %20 = vector.multi_reduction <add>, %19, %cst_11 [1] : vector<8x8xf32> to vector<8xf32>
    %21 = vector.shape_cast %20 : vector<8xf32> to vector<8x1xf32>
    %22 = tpu.reciprocal %21 {approx = true} : vector<8x1xf32> -> vector<8x1xf32>
    %23 = vector.broadcast %22 : vector<8x1xf32> to vector<8x8xf32>
    %24 = arith.mulf %19, %23 : vector<8x8xf32>
    %c0_12 = arith.constant 0 : index
    %c0_13 = arith.constant 0 : index
    %25 = vector.load %arg5[%c0_12, %c0_13] : memref<8x8xf32, #tpu.memory_space<vmem>>, vector<8x8xf32>
    tpu.vector_store %arg5[%c0_12, %c0_13], %24 {strides = array<i32>} : memref<8x8xf32, #tpu.memory_space<vmem>>, vector<8x8xf32>,
    return
  }
  func.func @transform_0(%arg0: i32) -> (i32, i32) {
    %c0_i32 = arith.constant 0 : i32
    %c0_i32_0 = arith.constant 0 : i32
    return %arg0, %c0_i32 : i32, i32
  }
  func.func @transform_1(%arg0: i32) -> (i32, i32) {
    %c0_i32 = arith.constant 0 : i32
    %c0_i32_0 = arith.constant 0 : i32
    %c0_i32_1 = arith.constant 0 : i32
    return %c0_i32, %c0_i32_0 : i32, i32
  }
  func.func @transform_2(%arg0: i32) -> (i32, i32, i32) {
    %c0_i32 = arith.constant 0 : i32
    %c0_i32_0 = arith.constant 0 : i32
    %c0_i32_1 = arith.constant 0 : i32
    return %arg0, %c0_i32, %c0_i32_0 : i32, i32, i32
  }
  func.func @transform_3(%arg0: i32) -> (i32, i32) {
    %c0_i32 = arith.constant 0 : i32
    %c0_i32_0 = arith.constant 0 : i32
    return %arg0, %c0_i32 : i32, i32
  }
  func.func @transform_4(%arg0: i32) -> (i32, i32) {
    %c0_i32 = arith.constant 0 : i32
    %c0_i32_0 = arith.constant 0 : i32
    return %arg0, %c0_i32 : i32, i32
  }
}

</mosaic_0001>

<bundles_post_ra>
// kernel: tpu_custom_call.1
= control target key start
LH: loop header
LB: loop body
LE: loop exit
PB: predicated region body
PF: predicated region fallthrough
CT: control target
= control target key end

     0   :  { %v612_v1 = vmov 0.0   ;;  %vm613_vm0 = vmmov 0   ;;  %s783_s0 = inlined_call_operand.vmem [shape: bf16[8,32], index: 0, kind: input, shape index: {}]   ;;  %s784_s1 = inlined_call_operand.vmem [shape: bf16[32,32], index: 1, kind: input, shape index: {}]   ;;  %s785_s2 = inlined_call_operand.vmem [shape: bf16[8,32,8], index: 2, kind: input, shape index: {}]   ;;  %s786_s3 = inlined_call_operand.vmem [shape: s8[8,8], index: 3, kind: input, shape index: {}]   ;;  %s787_s4 = inlined_call_operand.hbm [shape: f32[8,8], index: 4, kind: output, shape index: {}]  }
   0x1   :  { %v582_v0 = vld [vmem:[%s784_s1] sm:$0xff]   ;;  %571 = vmatprep.subr.bf16.mxu0 %v612_v1  ;;  %v583_v2 = vld [vmem:[%s784_s1 + $0x8] sm:$0xff]   ;;  %575 = vmatprep.mubr.msk.bf16.mxu0 %vm613_vm0, %v612_v1 }
   0x2   :  { %572 = vmatpush3.bf16.msra.mxu0 %v582_v0 }
   0x3   :  { %9 = vsyncpa [#allocation3], 0  ;;  %573 = vmatprep.subr.bf16.mxu0 %v612_v1  ;;  %v19_v3 = vld [vmem:[%s783_s0] sm:$0xf]  ;;  %vm36_vm1 = vcmask 261120   ;;  %v80_v4 = vlaneseq  ;;  %v554_v40 = vld [vmem:[%s785_s2 + $0x10] sm:$0xff]  }
   0x4   :  { %v556_v41 = vld [vmem:[%s785_s2 + $0x20] sm:$0xff]   ;;  %v555_v42 = vld [vmem:[%s785_s2 + $0x18] sm:$0xff]   ;;  %v500_v44 = vunpack.c.h.bf16 %v554_v40  ;;  %v499_v45 = vunpack.c.l.bf16 %v554_v40  ;;  %v553_v48 = vld [vmem:[%s785_s2 + $0x8] sm:$0xff]   ;;  %vm328_vm2 = vcmask 64512   ;;  %vm444_vm3 = vcmask 1041409  }
   0x5   :  { %v81_v5 = vshrl.u32 %v80_v4, 7  ;;  %v490_v43 = vld [vmem:[%s785_s2] sm:$0xff]   ;;  %v508_v46 = vunpack.c.h.bf16 %v556_v41  ;;  %v507_v47 = vunpack.c.l.bf16 %v556_v41  ;;  %v557_v49 = vld [vmem:[%s785_s2 + $0x28] sm:$0xff]   ;;  %v503_v52 = vunpack.c.l.bf16 %v555_v42  ;;  %v558_v53 = vld [vmem:[%s785_s2 + $0x30] sm:$0xff]  }
   0x6   :  { %574 = vmatpush3.bf16.msra.mxu0 %v583_v2  ;;  %v491_v54 = vunpack.c.l.bf16 %v490_v43  ;;  %v492_v55 = vunpack.c.h.bf16 %v490_v43  ;;  %v677_v56 = vld [vmem:[%s785_s2 + $0x40] sm:$0xff]   ;;  %v495_v58 = vunpack.c.l.bf16 %v553_v48  ;;  %v511_v59 = vunpack.c.l.bf16 %v557_v49  ;;  %v682_v60 = vld [vmem:[%s785_s2 + $0x38] sm:$0xff]  }
   0x7   :  { %v101_v6 = vsub.s32 1, %v81_v5  ;;  %v82_v7 = vsub.s32 0, %v81_v5  ;;  %v120_v14 = vsub.s32 2, %v81_v5  ;;  %v139_v16 = vsub.s32 3, %v81_v5 }
   0x8   :  { %v158_v18 = vsub.s32 4, %v81_v5  ;;  %v177_v20 = vsub.s32 5, %v81_v5  ;;  %v196_v22 = vsub.s32 6, %v81_v5  ;;  %v215_v24 = vsub.s32 7, %v81_v5 }
   0x9   :  { %576 = vmatmul.mubr.msk.bf16.vlgmr.msra.gmra.mrb[0].mxu0 %vm36_vm1, %v19_v3  ;;  %v504_v61 = vunpack.c.h.bf16 %v555_v42  ;;  %v516_v1 = vunpack.c.h.bf16 %v558_v53  ;;  %v515_v5 = vunpack.c.l.bf16 %v558_v53  ;;  %v564_v42 = vld [vmem:[%s785_s2 + $0x60] sm:$0xff]   ;;  %vm446_vm4 = vcmask 1042434  }
   0xa   :  { %vm448_vm5 = vcmask 1043459   ;;  %vm450_vm6 = vcmask 1044484   ;;  %vm452_vm7 = vcmask 1045509   ;;  %vm454_vm8 = vcmask 1046534  }
   0xb   :  { %vm456_vm9 = vcmask 1047559  }
  0xdc   :  { %v74_v8 = vpop.f32.mrb[0].mxu0 }
  0xdd   :  { %v577_v9 = vpop.f32.mrb[1].mxu0  ;;  %v102_v10 = vrot.slane %v74_v8, %v101_v6  ;;  %v83_v11 = vrot.slane %v74_v8, %v82_v7  ;;  %v121_v15 = vrot.slane %v74_v8, %v120_v14  ;;  %v140_v17 = vrot.slane %v74_v8, %v139_v16  ;;  %v562_v16 = vld [vmem:[%s785_s2 + $0x50] sm:$0xff]  }
  0xde   :  { %v77_v12 = vpop.f32.mrb[2].mxu0  ;;  %v159_v19 = vrot.slane %v74_v8, %v158_v18  ;;  %v178_v21 = vrot.slane %v74_v8, %v177_v20  ;;  %v197_v23 = vrot.slane %v74_v8, %v196_v22  ;;  %v216_v25 = vrot.slane %v74_v8, %v215_v24 }
  0xdf   :  { %104 = vbcast.lane.b32.xlu1 %v102_v10, 256  ;;  %85 = vbcast.lane.b32.xlu0 %v83_v11, 256  ;;  %v578_v13 = vpop.f32.mrb[3].mxu0  ;;  %v523_v6 = vunpack.c.l.bf16 %v677_v56  ;;  %v512_v7 = vunpack.c.h.bf16 %v557_v49  ;;  %v496_v9 = vunpack.c.h.bf16 %v553_v48  ;;  %v719_v49 = vld [vmem:[%s785_s2 + $0x58] sm:$0xff]  }
  0xe3   :  { %108 = vbcast.lane.b32.xlu1 %v102_v10, 264  ;;  %89 = vbcast.lane.b32.xlu0 %v83_v11, 264 }
  0xe7   :  { %127 = vbcast.lane.b32.xlu1 %v121_v15, 264  ;;  %123 = vbcast.lane.b32.xlu0 %v121_v15, 256 }
  0xeb   :  { %112 = vbcast.lane.b32.xlu1 %v102_v10, 272  ;;  %93 = vbcast.lane.b32.xlu0 %v83_v11, 272 }
  0xef   :  { %146 = vbcast.lane.b32.xlu1 %v140_v17, 264  ;;  %142 = vbcast.lane.b32.xlu0 %v140_v17, 256 }
  0xf3   :  { %161 = vbcast.lane.b32.xlu1 %v159_v19, 256  ;;  %131 = vbcast.lane.b32.xlu0 %v121_v15, 272 }
  0xf7   :  { %97 = vbcast.lane.b32.xlu1 %v83_v11, 280  ;;  %165 = vbcast.lane.b32.xlu0 %v159_v19, 264  ;;  %v519_v11 = vunpack.c.l.bf16 %v682_v60 }
  0xfb   :  { %150 = vbcast.lane.b32.xlu1 %v140_v17, 272  ;;  %116 = vbcast.lane.b32.xlu0 %v102_v10, 280  ;;  %v524_v10 = vunpack.c.h.bf16 %v677_v56 }
  0xff   :  { %184 = vbcast.lane.b32.xlu1 %v178_v21, 264  ;;  %180 = vbcast.lane.b32.xlu0 %v178_v21, 256 }
 0x103   :  { %169 = vbcast.lane.b32.xlu1 %v159_v19, 272  ;;  %135 = vbcast.lane.b32.xlu0 %v121_v15, 280 }
 0x107   :  { %203 = vbcast.lane.b32.xlu1 %v197_v23, 264  ;;  %199 = vbcast.lane.b32.xlu0 %v197_v23, 256 }
 0x10b   :  { %188 = vbcast.lane.b32.xlu1 %v178_v21, 272  ;;  %154 = vbcast.lane.b32.xlu0 %v140_v17, 280 }
 0x10f   :  { %222 = vbcast.lane.b32.xlu1 %v216_v25, 264  ;;  %218 = vbcast.lane.b32.xlu0 %v216_v25, 256 }
 0x113   :  { %207 = vbcast.lane.b32.xlu1 %v197_v23, 272  ;;  %173 = vbcast.lane.b32.xlu0 %v159_v19, 280 }
 0x117   :  { %226 = vbcast.lane.b32.xlu1 %v216_v25, 272  ;;  %192 = vbcast.lane.b32.xlu0 %v178_v21, 280 }
 0x11b   :  { %230 = vbcast.lane.b32.xlu1 %v216_v25, 280  ;;  %211 = vbcast.lane.b32.xlu0 %v197_v23, 280 }
 0x151   :  { %v105_v26 = vpop.permute.xlu1 %104  ;;  %v86_v27 = vpop.permute.xlu0 %85 }
 0x152   :  { %v300_v62 = vmul.f32 %v499_v45, %v105_v26  ;;  %v296_v12 = vmul.f32 %v491_v54, %v86_v27  ;;  %v566_v54 = vld [vmem:[%s785_s2 + $0x70] sm:$0xff]  }
 0x154   :  { %v342_v17 = vsel %vm328_vm2, %v300_v62, 0.0  ;;  %v535_v62 = vunpack.c.l.bf16 %v719_v49 }
 0x155   :  { %v109_v28 = vpop.permute.xlu1 %108  ;;  %v90_v29 = vpop.permute.xlu0 %89 }
 0x156   :  { %v301_v57 = vmul.f32 %v500_v44, %v109_v28  ;;  %v297_v8 = vmul.f32 %v492_v55, %v90_v29  ;;  %v532_v29 = vunpack.c.h.bf16 %v562_v16 }
 0x158   :  { %v343_v13 = vsel %vm328_vm2, %v301_v57, 0.0  ;;  %v330_v28 = vsel %vm328_vm2, %v297_v8, 0.0  ;;  %v540_v57 = vunpack.c.h.bf16 %v564_v42  ;;  %v733_v8 = vld [vmem:[%s785_s2 + $0x68] sm:$0xff]  }
 0x159   :  { %v128_v30 = vpop.permute.xlu1 %127  ;;  %v124_v31 = vpop.permute.xlu0 %123  ;;  %v344_v27 = vadd.f32 %v343_v13, %v342_v17 }
 0x15a   :  { %v305_v63 = vmul.f32 %v508_v46, %v128_v30  ;;  %v304_v0 = vmul.f32 %v507_v47, %v124_v31  ;;  %v531_v30 = vunpack.c.l.bf16 %v562_v16 }
 0x15c   :  { %v356_v18 = vsel %vm328_vm2, %v305_v63, 0.0  ;;  %v355_v19 = vsel %vm328_vm2, %v304_v0, 0.0 }
 0x15d   :  { %v113_v32 = vpop.permute.xlu1 %112  ;;  %v94_v33 = vpop.permute.xlu0 %93 }
 0x15e   :  { %v302_v4 = vmul.f32 %v503_v52, %v113_v32  ;;  %v298_v20 = vmul.f32 %v495_v58, %v94_v33  ;;  %v705_v33 = vld [vmem:[%s785_s2 + $0x48] sm:$0xff]   ;;  %v539_v58 = vunpack.c.l.bf16 %v564_v42 }
 0x15f   :  { %v527_v53 = vunpack.c.l.bf16 %v705_v33 }
 0x160   :  { %v345_v23 = vsel %vm328_vm2, %v302_v4, 0.0  ;;  %v332_v45 = vsel %vm328_vm2, %v298_v20, 0.0  ;;  %v528_v20 = vunpack.c.h.bf16 %v705_v33 }
 0x161   :  { %v147_v34 = vpop.permute.xlu1 %146  ;;  %v143_v35 = vpop.permute.xlu0 %142  ;;  %v346_v41 = vadd.f32 %v345_v23, %v344_v27  ;;  %v536_v23 = vunpack.c.h.bf16 %v719_v49 }
 0x162   :  { %v309_v24 = vmul.f32 %v516_v1, %v147_v34  ;;  %v308_v25 = vmul.f32 %v515_v5, %v143_v35  ;;  %v329_v34 = vsel %vm328_vm2, %v296_v12, 0.0  ;;  %v357_v35 = vadd.f32 %v356_v18, %v355_v19 }
 0x163   :  { %v543_v19 = vunpack.c.l.bf16 %v733_v8 }
 0x164   :  { %v369_v46 = vsel %vm328_vm2, %v309_v24, 0.0  ;;  %v368_v47 = vsel %vm328_vm2, %v308_v25, 0.0 }
 0x165   :  { %v649_v36 = vpop.permute.xlu1 %161  ;;  %v132_v37 = vpop.permute.xlu0 %131 }
 0x166   :  { %v306_v14 = vmul.f32 %v511_v59, %v132_v37  ;;  %v312_v1 = vmul.f32 %v523_v6, %v649_v36 }
 0x168   :  { %v358_v31 = vsel %vm328_vm2, %v306_v14, 0.0  ;;  %v739_v14 = vld [vmem:[%s785_s2 + $0x78] sm:$0xff]  }
 0x169   :  { %v98_v38 = vpop.permute.xlu1 %97  ;;  %v651_v39 = vpop.permute.xlu0 %165 }
 0x16a   :  { %v299_v32 = vmul.f32 %v496_v9, %v98_v38  ;;  %v520_v38 = vunpack.c.h.bf16 %v682_v60  ;;  %v370_v60 = vadd.f32 %v369_v46, %v368_v47  ;;  %v313_v4 = vmul.f32 %v524_v10, %v651_v39 }
 0x16b   :  { %v547_v10 = vunpack.c.l.bf16 %v566_v54 }
 0x16c   :  { %v334_v55 = vsel %vm328_vm2, %v299_v32, 0.0 }
 0x16d   :  { %v151_v50 = vpop.permute.xlu1 %150  ;;  %v117_v51 = vpop.permute.xlu0 %116 }
 0x16e   :  { %v303_v15 = vmul.f32 %v504_v61, %v117_v51  ;;  %v310_v37 = vmul.f32 %v519_v11, %v151_v50  ;;  %v331_v50 = vadd.f32 %v330_v28, %v329_v34  ;;  %v359_v51 = vadd.f32 %v358_v31, %v357_v35 }
 0x170   :  { %v347_v40 = vsel %vm328_vm2, %v303_v15, 0.0  ;;  %v371_v56 = vsel %vm328_vm2, %v310_v37, 0.0  ;;  %v333_v59 = vadd.f32 %v332_v45, %v331_v50 }
 0x171   :  { %v684_v2 = vpop.permute.xlu1 %184  ;;  %v686_v3 = vpop.permute.xlu0 %180  ;;  %v348_v52 = vadd.f32 %v347_v40, %v346_v41  ;;  %v372_v11 = vadd.f32 %v371_v56, %v370_v60 }
 0x172   :  { %v335_v9 = vadd.f32 %v334_v55, %v333_v59  ;;  %v317_v13 = vmul.f32 %v532_v29, %v684_v2  ;;  %v316_v36 = vmul.f32 %v531_v30, %v686_v3  ;;  %v382_v2 = vsel %vm328_vm2, %v313_v4, 0.0 }
 0x173   :  { %v349_v12 = vrot.slane %v348_v52, 4  ;;  %v552_v3 = vunpack.c.h.bf16 %v739_v14 }
 0x174   :  { %v336_v24 = vrot.slane %v335_v9, 4  ;;  %v394_v27 = vsel %vm328_vm2, %v316_v36, 0.0 }
 0x175   :  { %v170_v21 = vpop.permute.xlu1 %169  ;;  %v136_v22 = vpop.permute.xlu0 %135  ;;  %v350_v25 = vadd.f32 %v349_v12, %v348_v52 }
 0x176   :  { %v307_v26 = vmul.f32 %v512_v7, %v136_v22  ;;  %v548_v7 = vunpack.c.h.bf16 %v566_v54  ;;  %v314_v39 = vmul.f32 %v527_v53, %v170_v21  ;;  %v551_v22 = vunpack.c.l.bf16 %v739_v14 }
 0x177   :  { %v381_v21 = vsel %vm328_vm2, %v312_v1, 0.0  ;;  %v337_v45 = vadd.f32 %v336_v24, %v335_v9  ;;  %v351_v46 = vrot.slane %v350_v25, 2 }
 0x178   :  { %v360_v48 = vsel %vm328_vm2, %v307_v26, 0.0  ;;  %v395_v26 = vsel %vm328_vm2, %v317_v13, 0.0  ;;  %v384_v28 = vsel %vm328_vm2, %v314_v39, 0.0  ;;  %v383_v31 = vadd.f32 %v382_v2, %v381_v21 }
 0x179   :  { %v204_v43 = vpop.permute.xlu1 %203  ;;  %v200_v44 = vpop.permute.xlu0 %199  ;;  %v361_v61 = vadd.f32 %v360_v48, %v359_v51  ;;  %v396_v47 = vadd.f32 %v395_v26, %v394_v27  ;;  %v352_v14 = vadd.f32 %v351_v46, %v350_v25 }
 0x17a   :  { %v321_v37 = vmul.f32 %v540_v57, %v204_v43  ;;  %v320_v40 = vmul.f32 %v539_v58, %v200_v44  ;;  %v385_v48 = vadd.f32 %v384_v28, %v383_v31 }
 0x17b   :  { %v362_v15 = vrot.slane %v361_v61, 4  ;;  %v353_v26 = vrot.slane %v352_v14, 1 }
 0x17c   :  { %v408_v43 = vsel %vm328_vm2, %v321_v37, 0.0  ;;  %v407_v44 = vsel %vm328_vm2, %v320_v40, 0.0 }
 0x17d   :  { %v189_v63 = vpop.permute.xlu1 %188  ;;  %v155_v0 = vpop.permute.xlu0 %154  ;;  %v363_v32 = vadd.f32 %v362_v15, %v361_v61  ;;  %v338_v61 = vrot.slane %v337_v45, 2 }
 0x17e   :  { %v311_v5 = vmul.f32 %v520_v38, %v155_v0  ;;  %v318_v29 = vmul.f32 %v535_v62, %v189_v63  ;;  %v544_v38 = vunpack.c.h.bf16 %v733_v8 }
 0x17f   :  { %v364_v53 = vrot.slane %v363_v32, 2 }
 0x180   :  { %v373_v6 = vsel %vm328_vm2, %v311_v5, 0.0  ;;  %v397_v49 = vsel %vm328_vm2, %v318_v29, 0.0 }
 0x181   :  { %v374_v16 = vadd.f32 %v373_v6, %v372_v11  ;;  %v223_v17 = vpop.permute.xlu1 %222  ;;  %v219_v18 = vpop.permute.xlu0 %218  ;;  %v398_v62 = vadd.f32 %v397_v49, %v396_v47  ;;  %v365_v36 = vadd.f32 %v364_v53, %v363_v32 }
 0x182   :  { %v325_v35 = vmul.f32 %v548_v7, %v223_v17  ;;  %v324_v41 = vmul.f32 %v547_v10, %v219_v18  ;;  %v409_v7 = vadd.f32 %v408_v43, %v407_v44  ;;  %v339_v18 = vadd.f32 %v338_v61, %v337_v45 }
 0x183   :  { %v375_v30 = vrot.slane %v374_v16, 4  ;;  %v366_v27 = vrot.slane %v365_v36, 1 }
 0x184   :  { %v421_v57 = vsel %vm328_vm2, %v325_v35, 0.0  ;;  %v420_v58 = vsel %vm328_vm2, %v324_v41, 0.0  ;;  %v340_v29 = vrot.slane %v339_v18, 1 }
 0x185   :  { %v208_v33 = vpop.permute.xlu1 %207  ;;  %v174_v34 = vpop.permute.xlu0 %173  ;;  %v376_v50 = vadd.f32 %v375_v30, %v374_v16  ;;  %v422_v8 = vadd.f32 %v421_v57, %v420_v58 }
 0x186   :  { %v315_v42 = vmul.f32 %v528_v20, %v174_v34  ;;  %v322_v51 = vmul.f32 %v543_v19, %v208_v33  ;;  %v354_v33 = vadd.f32 %v353_v26, %v352_v14  ;;  %v367_v34 = vadd.f32 %v366_v27, %v365_v36 }
 0x187   :  { %v377_v0 = vrot.slane %v376_v50, 2  ;;  %v341_v45 = vadd.f32 %v340_v29, %v339_v18 }
 0x188   :  { %v386_v52 = vsel %vm328_vm2, %v315_v42, 0.0  ;;  %v410_v1 = vsel %vm328_vm2, %v322_v51, 0.0 }
 0x189   :  { %v387_v54 = vadd.f32 %v386_v52, %v385_v48  ;;  %v227_v55 = vpop.permute.xlu1 %226  ;;  %v193_v56 = vpop.permute.xlu0 %192  ;;  %v411_v10 = vadd.f32 %v410_v1, %v409_v7  ;;  %v378_v19 = vadd.f32 %v377_v0, %v376_v50  ;;  %v445_v50 = vsel %vm444_vm3, %v354_v33, %v341_v45 }
 0x18a   :  { %v326_v59 = vmul.f32 %v551_v22, %v227_v55  ;;  %v319_v60 = vmul.f32 %v536_v23, %v193_v56  ;;  %v447_v44 = vsel %vm446_vm4, %v367_v34, %v445_v50 }
 0x18b   :  { %v388_v63 = vrot.slane %v387_v54, 4  ;;  %v379_v30 = vrot.slane %v378_v19, 1 }
 0x18c   :  { %v423_v4 = vsel %vm328_vm2, %v326_v59, 0.0  ;;  %v399_v5 = vsel %vm328_vm2, %v319_v60, 0.0 }
 0x18d   :  { %v389_v9 = vadd.f32 %v388_v63, %v387_v54  ;;  %v400_v11 = vadd.f32 %v399_v5, %v398_v62  ;;  %v231_v12 = vpop.permute.xlu1 %230  ;;  %v212_v13 = vpop.permute.xlu0 %211  ;;  %v424_v16 = vadd.f32 %v423_v4, %v422_v8  ;;  %v380_v46 = vadd.f32 %v379_v30, %v378_v19 }
 0x18e   :  { %v327_v39 = vmul.f32 %v552_v3, %v231_v12  ;;  %v323_v6 = vmul.f32 %v544_v38, %v212_v13  ;;  %v433_v38 = vld [vmem:[%s786_s3] sm:$0x3]  ;;  %s614_s3 = smov [#allocation2]  }
 0x18f   :  { %v390_v15 = vrot.slane %v389_v9, 2  ;;  %v401_v17 = vrot.slane %v400_v11, 4  ;;  %v434_v52 = vunpack.c.0.s8 %v433_v38  ;;  %v449_v54 = vsel %vm448_vm5, %v380_v46, %v447_v44  ;;  %s478_s24 = sshll.u32 %s614_s3, 4  ;;  %s479_s24 = int_to_ptr.vmem [resolvable:$true] %s478_s24 }
 0x190   :  { %v425_v20 = vsel %vm328_vm2, %v327_v39, 0.0  ;;  %v412_v2 = vsel %vm328_vm2, %v323_v6, 0.0  ;;  %s588_s25 = scalar_lea.vmem %s479_s24, 128  ;;  %p593_p1 = scmp.lt.s32.totalorder %s479_s24, %s479_s24 }
 0x191   :  { %v391_v22 = vadd.f32 %v390_v15, %v389_v9  ;;  %v402_v23 = vadd.f32 %v401_v17, %v400_v11  ;;  %v426_v21 = vadd.f32 %v425_v20, %v424_v16  ;;  %v413_v24 = vadd.f32 %v412_v2, %v411_v10  ;;  %p589_p0 = scmp.ne.s32.totalorder %s479_s24, %s588_s25  ;;  %p594_p2 = scmp.lt.s32.totalorder %s588_s25, %s588_s25 }
 0x192   :  { %vm435_vm10 = vcmp.ne.s32.totalorder %v434_v52, 0 }
 0x193   :  { %v403_v25 = vrot.slane %v402_v23, 2  ;;  %v427_v28 = vrot.slane %v426_v21, 4  ;;  %v414_v3 = vrot.slane %v413_v24, 4  ;;  %v392_v31 = vrot.slane %v391_v22, 1  ;;  %p595_p3 = por %p594_p2, %p593_p1 }
 0x195   :  { %v404_v32 = vadd.f32 %v403_v25, %v402_v23  ;;  %v428_v37 = vadd.f32 %v427_v28, %v426_v21  ;;  %v415_v40 = vadd.f32 %v414_v3, %v413_v24  ;;  %v393_v47 = vadd.f32 %v392_v31, %v391_v22  ;;  %p596_p4 = pnand %p595_p3, %p589_p0 }
 0x197   :  { %v405_v35 = vrot.slane %v404_v32, 1  ;;  %v429_v41 = vrot.slane %v428_v37, 2  ;;  %v416_v42 = vrot.slane %v415_v40, 2  ;;  %v451_v57 = vsel %vm450_vm6, %v393_v47, %v449_v54 }
 0x199   :  { %v430_v48 = vadd.f32 %v429_v41, %v428_v37  ;;  %v417_v49 = vadd.f32 %v416_v42, %v415_v40  ;;  %v406_v51 = vadd.f32 %v405_v35, %v404_v32 }
 0x19b   :  { %v418_v53 = vrot.slane %v417_v49, 1  ;;  %v431_v43 = vrot.slane %v430_v48, 1  ;;  %v453_v58 = vsel %vm452_vm7, %v406_v51, %v451_v57 }
 0x19d   :  { %v419_v55 = vadd.f32 %v418_v53, %v417_v49  ;;  %v432_v56 = vadd.f32 %v431_v43, %v430_v48 }
 0x19f   :  { %v455_v59 = vsel %vm454_vm8, %v419_v55, %v453_v58 }
 0x1a0   :  { %v457_v60 = vsel %vm456_vm9, %v432_v56, %v455_v59 }
 0x1a1   :  { %v459_v61 = vsel %vm435_vm10, %v457_v60, -inf }
 0x1a2   :  { %v460_v62 = vsel %vm328_vm2, %v459_v61, -inf }
 0x1a3   :  { %461 = vmax.xlane.f32.xlu0 %v460_v62 }
 0x230   :  { %v462_v63 = vpop.xlane.xlu0 %461 }
 0x231   :  { %v463_v0 = vsub.f32 %v459_v61, %v462_v63 }
 0x233   :  { %v464_v1 = vmul.f32 1.442695, %v463_v0 }
 0x235   :  { %584 = vpow2.f32 %v464_v1 }
 0x23f   :  { %v585_v4 = vpop.eup %584 }
 0x240   :  { %v466_v5 = vsel %vm328_vm2, %v585_v4, 0.0 }
 0x241   :  { %467 = vadd.xlane.f32.xlu1 %v466_v5 }
 0x2ce   :  { %v468_v7 = vpop.xlane.xlu1 %467 }
 0x2cf   :  { %586 = vrcp.f32 %v468_v7 }
 0x2d9   :  { %v587_v8 = vpop.eup %586 }
 0x2da   :  { %v470_v9 = vmul.f32 %v587_v8, %v585_v4 }
 0x2dc   :  { %471 = vst.msk [vmem:[#allocation2] sm:$0xff] %vm328_vm2, %v470_v9 }
 0x2dd   :  { %599 = shalt.err (!%p596_p4)
}
 0x2de   :  { %s600_s28 = scalar_lea.hbm %s787_s4, 128 }
 0x2df   :  { %p601_p5 = scmp.ne.s32.totalorder %s787_s4, %s600_s28  ;;  %p604_p6 = scmp.lt.u32.totalorder %s600_s28, %s787_s4 }
 0x2e1   :  { %p606_p7 = pnand %p604_p6, %p601_p5 }
 0x2e3   :  { %609 = shalt.err (!%p606_p7)
}
 0x2e4   :  { %481 = dma.vmem_to_hbm [thread:$0]  %s479_s24, 128, %s787_s4, [#allocation3]  }
 0x2e5   :  { %610 = dma.done.wait [#allocation3], 128  }
 0x2e6   :  { %611 = vsyncadd [#allocation3], 4294967168 }
 0x2e7   :  { %485 = vsyncpa [#allocation3], 1 }

</bundles_post_ra>
